<compile_context>
chip_gen: v7x
topology: tpu7x:2x2x1
jax: 0.10.0
libtpu: 0.0.40
codegen_flags: <defaults>
</compile_context>

<pallas_src>
import functools

import jax
import jax.numpy as jnp
from jax.experimental import pallas as pl
from jax.experimental.pallas import tpu as pltpu


# ----------------------------------------------------------------------------
# Pallas kernels
# ----------------------------------------------------------------------------
def _conv3x3_matmul_kernel(x_ref, w_ref, b_ref, out_ref, *, apply_relu):
    """Fused 3x3 conv + bias (+ ReLU) as a single lane-dense MXU matmul.

    x_ref:   (N, H, K)        K = 3*(W+2)*Cin; row (n, y) holds the 3 padded
                              input rows y..y+2 flattened as (dy, col, cin).
    w_ref:   (K, W*Cout)      banded conv weight (zeros outside the 3x3 taps).
    b_ref:   (1, W*Cout)      bias tiled over output columns.
    out_ref: (N, H, W*Cout)   lane-dense output (W*Cout is a multiple of 128
                              for these channel counts) -> unmasked stores.
    """
    n, h, k = x_ref.shape
    wc = out_ref.shape[-1]
    # Leading-dim merge only (last dim preserved): no lane relayout.
    x2d = x_ref[...].reshape(n * h, k)
    acc = jnp.dot(x2d, w_ref[...], preferred_element_type=jnp.float32)
    acc = acc + b_ref[...]                      # (1, W*Cout) broadcast
    if apply_relu:
        acc = jnp.maximum(acc, 0.0)
    # Leading-dim split only: no lane relayout.
    out_ref[...] = acc.reshape(n, h, wc).astype(out_ref.dtype)


def _relu_kernel(x_ref, o_ref):
    o_ref[...] = jnp.maximum(x_ref[...], 0.0)


# ----------------------------------------------------------------------------
# Wrapper-side (pure layout) helpers
# ----------------------------------------------------------------------------
def _banded_conv_weight(weight_oihw, w_out):
    """(Cout, Cin, 3, 3) -> (3*(W+2)*Cin, W*Cout) banded matmul weight.

    Row index = dy*(W+2)*Cin + xc*Cin + ci   (window row, padded column, chan)
    Col index = wo*Cout + co                 (output column, output channel)
    Entry     = weight[co, ci, dy, xc - wo]  if 0 <= xc - wo < 3 else 0
    Built from jnp ops only; under jit it constant-folds (weights are consts).
    """
    cout, cin, kh, kw = weight_oihw.shape
    w_hwio = jnp.transpose(weight_oihw, (2, 3, 1, 0))      # (3, 3, Cin, Cout)
    eye = jnp.eye(w_out, dtype=weight_oihw.dtype)
    blocks = []
    for dy in range(kh):
        acc = None
        for dx in range(kw):
            bd = jnp.einsum("ab,io->aibo", eye, w_hwio[dy, dx])
            bd = bd.reshape(w_out * cin, w_out * cout)      # block-diag per tap
            bd = jnp.pad(bd, ((dx * cin, (kw - 1 - dx) * cin), (0, 0)))
            acc = bd if acc is None else acc + bd
        blocks.append(acc)                                   # ((W+2)*Cin, W*Cout)
    return jnp.concatenate(blocks, axis=0)                   # (3*(W+2)*Cin, W*Cout)


def conv3x3_pallas(x_nhwc, weight_oihw, bias, *, apply_relu=False):
    """Conv2d(3x3, stride=1, padding=1) (+ optional fused ReLU), NHWC in/out."""
    n, h, w, cin = x_nhwc.shape
    cout = weight_oihw.shape[0]
    k = 3 * (w + 2) * cin
    wc = w * cout

    # Layout-only glue in XLA: pad, fold channels into lanes, and gather the
    # three padded input rows each output row consumes.
    x_pad = jnp.pad(x_nhwc, ((0, 0), (1, 1), (1, 1), (0, 0)))
    x_flat = x_pad.reshape(n, h + 2, (w + 2) * cin)
    x_rows = jnp.concatenate(
        [x_flat[:, dy:dy + h, :] for dy in range(3)], axis=-1)   # (N, H, K)
    w_big = _banded_conv_weight(weight_oihw, w)                  # (K, W*Cout)
    b_row = jnp.tile(bias, (w,)).reshape(1, wc)                  # (1, W*Cout)

    kernel = functools.partial(_conv3x3_matmul_kernel, apply_relu=apply_relu)
    out = pl.pallas_call(
        kernel,
        out_shape=jax.ShapeDtypeStruct((n, h, wc), x_nhwc.dtype),
        # Whole batch in one step: M = N*H amortizes the ~0.35us/step overhead.
        # (If N/H grow: grid over batch with dimension_semantics=("parallel",)
        #  to shard across v7x's two TensorCores; cap blocks vs 64 MiB VMEM.)
        grid=(1,),
        in_specs=[
            pl.BlockSpec((n, h, k), lambda i: (0, 0, 0)),
            pl.BlockSpec((k, wc), lambda i: (0, 0)),
            pl.BlockSpec((1, wc), lambda i: (0, 0)),
        ],
        out_specs=pl.BlockSpec((n, h, wc), lambda i: (0, 0, 0)),
        compiler_params=pltpu.CompilerParams(
            dimension_semantics=("arbitrary",)),
    )(x_rows, w_big, b_row)
    # Free metadata reshape back to NHWC.
    return out.reshape(n, h, w, cout)


def relu_pallas(x_nhwc):
    """Standalone ReLU (used only when it cannot be fused into a conv)."""
    n, h, w, c = x_nhwc.shape
    x2d = x_nhwc.reshape(n * h, w * c)          # free, lane-dense presentation
    out = pl.pallas_call(
        _relu_kernel,
        out_shape=jax.ShapeDtypeStruct((n * h, w * c), x_nhwc.dtype),
        grid=(1,),
        in_specs=[pl.BlockSpec((n * h, w * c), lambda i: (0, 0))],
        out_specs=pl.BlockSpec((n * h, w * c), lambda i: (0, 0)),
    )(x2d)
    return out.reshape(n, h, w, c)


# ----------------------------------------------------------------------------
# Synthetic "original_model.model.net" + FeatureExtractor forward
# ----------------------------------------------------------------------------
class Conv3x3:
    def __init__(self, weight_oihw, bias):
        self.weight = weight_oihw
        self.bias = bias

    def __call__(self, x_nhwc, fuse_relu=False):
        return conv3x3_pallas(x_nhwc, self.weight, self.bias,
                              apply_relu=fuse_relu)


class ReLU:
    def __call__(self, x_nhwc):
        return relu_pallas(x_nhwc)


def build_net(key, cin=4, c1=8, c2=16):
    k1, k2, k3, k4 = jax.random.split(key, 4)
    w1 = 0.1 * jax.random.normal(k1, (c1, cin, 3, 3), dtype=jnp.float32)
    b1 = 0.1 * jax.random.normal(k2, (c1,), dtype=jnp.float32)
    w2 = 0.1 * jax.random.normal(k3, (c2, c1, 3, 3), dtype=jnp.float32)
    b2 = 0.1 * jax.random.normal(k4, (c2,), dtype=jnp.float32)
    modules = [
        ("conv1", Conv3x3(w1, b1)),
        ("relu1", ReLU()),
        ("conv2", Conv3x3(w2, b2)),
        ("relu2", ReLU()),
    ]
    params = dict(w1=w1, b1=b1, w2=w2, b2=b2)
    return modules, params


def _net_forward_nhwc(modules, layer_name, x):
    """Run modules in order (NHWC), return activation at layer_name.

    conv -> relu pairs are fused into a single Pallas kernel unless the conv's
    own (pre-ReLU) activation is the extraction target.
    """
    i = 0
    while i < len(modules):
        name, module = modules[i]
        nxt = modules[i + 1] if i + 1 < len(modules) else None
        if (isinstance(module, Conv3x3) and name != layer_name
                and nxt is not None and isinstance(nxt[1], ReLU)):
            x = module(x, fuse_relu=True)        # one fused conv+bias+ReLU kernel
            if nxt[0] == layer_name:
                return x
            i += 2
            continue
        x = module(x)
        if name == layer_name:
            return x
        i += 1
    print('Warning: Never passed through intended layer.')
    return None


def feature_extractor_forward(modules, layer_name, x_nchw):
    """Mirrors FeatureExtractor.forward; NCHW<->NHWC only at the boundary."""
    x_nhwc = jnp.transpose(x_nchw, (0, 2, 3, 1))
    out = _net_forward_nhwc(modules, layer_name, x_nhwc)
    if out is None:
        return None
    return jnp.transpose(out, (0, 3, 1, 2))


# ----------------------------------------------------------------------------
if __name__ == "__main__":
    N, C, H, W = 2, 4, 16, 16
    x = jax.random.normal(jax.random.PRNGKey(0), (N, C, H, W), dtype=jnp.float32)

    modules, p = build_net(jax.random.PRNGKey(42), cin=C, c1=8, c2=16)

    def extract(layer_name):
        return jax.jit(lambda xx: feature_extractor_forward(modules, layer_name, xx))

    # --- main extraction path: layer_name = "relu1" (fused conv1+ReLU kernel)
    out = extract("relu1")(x)
    out = jax.block_until_ready(out)
    assert out.shape == (N, 8, H, W), out.shape
    assert bool(jnp.all(out >= 0.0))

    # --- references (plain JAX) ---------------------------------------------
    def conv_ref(xi, w, b):
        y = jax.lax.conv_general_dilated(
            xi, w, window_strides=(1, 1), padding="SAME",
            dimension_numbers=("NCHW", "OIHW", "NCHW"))
        return y + b.reshape(1, -1, 1, 1)

    ref1_pre = conv_ref(x, p["w1"], p["b1"])
    ref1 = jnp.maximum(ref1_pre, 0.0)
    assert bool(jnp.allclose(out, ref1, atol=1e-4, rtol=1e-4))

    # extraction at "conv1" must be the PRE-ReLU activation (non-fused path)
    out_conv1 = jax.block_until_ready(extract("conv1")(x))
    assert bool(jnp.allclose(out_conv1, ref1_pre, atol=1e-4, rtol=1e-4))

    # extraction at "relu2" exercises conv2 (+ fused ReLU) as well
    out_relu2 = jax.block_until_ready(extract("relu2")(x))
    ref2 = jnp.maximum(conv_ref(ref1, p["w2"], p["b2"]), 0.0)
    assert out_relu2.shape == (N, 16, H, W)
    assert bool(jnp.allclose(out_relu2, ref2, atol=1e-4, rtol=1e-4))

    # standalone ReLU kernel sanity (only used when a ReLU can't be fused)
    a = jax.random.normal(jax.random.PRNGKey(7), (N, H, W, 8), dtype=jnp.float32)
    assert bool(jnp.allclose(jax.block_until_ready(relu_pallas(a)),
                             jnp.maximum(a, 0.0)))

    print("KERNEL_OK")
</pallas_src>

<mosaic_0001>
module attributes {stable_mosaic.version = 11 : i64} {
  func.func @_conv3x3_matmul_kernel(%arg0: i32, %arg1: memref<2x16x216xf32, #tpu.memory_space<vmem>>, %arg2: memref<216x128xf32, #tpu.memory_space<vmem>>, %arg3: memref<1x128xf32, #tpu.memory_space<vmem>>, %arg4: memref<2x16x128xf32, #tpu.memory_space<vmem>>) attributes {dimension_semantics = [#tpu.dimension_semantics<arbitrary>], iteration_bounds = array<i64: 1>, scalar_prefetch = 0 : i64, scratch_operands = 0 : i64, tpu.core_type = #tpu.core_type<tc>, window_params = [{pipeline_mode = #tpu.pipeline_mode<synchronous>, transform_indices = @transform_0, window_bounds = array<i64: 2, 16, 216>}, {pipeline_mode = #tpu.pipeline_mode<synchronous>, transform_indices = @transform_1, window_bounds = array<i64: 216, 128>}, {pipeline_mode = #tpu.pipeline_mode<synchronous>, transform_indices = @transform_2, window_bounds = array<i64: 1, 128>}, {pipeline_mode = #tpu.pipeline_mode<synchronous>, transform_indices = @transform_3, window_bounds = array<i64: 2, 16, 128>}]} {
    %c0 = arith.constant 0 : index
    %c0_0 = arith.constant 0 : index
    %c0_1 = arith.constant 0 : index
    %0 = vector.load %arg1[%c0, %c0_0, %c0_1] : memref<2x16x216xf32, #tpu.memory_space<vmem>>, vector<2x16x216xf32>
    %1 = vector.shape_cast %0 : vector<2x16x216xf32> to vector<32x216xf32>
    %c0_2 = arith.constant 0 : index
    %c0_3 = arith.constant 0 : index
    %2 = vector.load %arg2[%c0_2, %c0_3] : memref<216x128xf32, #tpu.memory_space<vmem>>, vector<216x128xf32>
    %cst = arith.constant dense<0.000000e+00> : vector<32x128xf32>
    %3 = tpu.matmul %1, %2, %cst {dimension_numbers = #tpu.dot_dimension_numbers<[1], [0], [0], [1], [0, 0, 1, 1], [], []>} : vector<32x216xf32>, vector<216x128xf32>, vector<32x128xf32> -> vector<32x128xf32>
    %c0_4 = arith.constant 0 : index
    %c0_5 = arith.constant 0 : index
    %4 = vector.load %arg3[%c0_4, %c0_5] : memref<1x128xf32, #tpu.memory_space<vmem>>, vector<1x128xf32>
    %5 = vector.broadcast %4 : vector<1x128xf32> to vector<32x128xf32>
    %6 = arith.addf %3, %5 : vector<32x128xf32>
    %cst_6 = arith.constant 0.000000e+00 : f32
    %7 = vector.broadcast %cst_6 : f32 to vector<32x128xf32>
    %8 = arith.maximumf %6, %7 : vector<32x128xf32>
    %9 = vector.shape_cast %8 : vector<32x128xf32> to vector<2x16x128xf32>
    %c0_7 = arith.constant 0 : index
    %c0_8 = arith.constant 0 : index
    %c0_9 = arith.constant 0 : index
    %10 = vector.load %arg4[%c0_7, %c0_8, %c0_9] : memref<2x16x128xf32, #tpu.memory_space<vmem>>, vector<2x16x128xf32>
    tpu.vector_store %arg4[%c0_7, %c0_8, %c0_9], %9 {strides = array<i32>} : memref<2x16x128xf32, #tpu.memory_space<vmem>>, vector<2x16x128xf32>,
    return
  }
  func.func @transform_0(%arg0: i32) -> (i32, i32, i32) {
    %c0_i32 = arith.constant 0 : i32
    %c0_i32_0 = arith.constant 0 : i32
    %c0_i32_1 = arith.constant 0 : i32
    %c0_i32_2 = arith.constant 0 : i32
    return %c0_i32, %c0_i32_0, %c0_i32_1 : i32, i32, i32
  }
  func.func @transform_1(%arg0: i32) -> (i32, i32) {
    %c0_i32 = arith.constant 0 : i32
    %c0_i32_0 = arith.constant 0 : i32
    %c0_i32_1 = arith.constant 0 : i32
    return %c0_i32, %c0_i32_0 : i32, i32
  }
  func.func @transform_2(%arg0: i32) -> (i32, i32) {
    %c0_i32 = arith.constant 0 : i32
    %c0_i32_0 = arith.constant 0 : i32
    %c0_i32_1 = arith.constant 0 : i32
    return %c0_i32, %c0_i32_0 : i32, i32
  }
  func.func @transform_3(%arg0: i32) -> (i32, i32, i32) {
    %c0_i32 = arith.constant 0 : i32
    %c0_i32_0 = arith.constant 0 : i32
    %c0_i32_1 = arith.constant 0 : i32
    %c0_i32_2 = arith.constant 0 : i32
    return %c0_i32, %c0_i32_0, %c0_i32_1 : i32, i32, i32
  }
}

</mosaic_0001>

<bundles_post_ra>
// kernel: tile.6
= control target key start
LH: loop header
LB: loop body
LE: loop exit
PB: predicated region body
PF: predicated region fallthrough
CT: control target
= control target key end

     0   :  { %s28_s0 = inlined_call_operand.vmem [shape: f32[8], index: 0, kind: input, shape index: {}]   ;;  %s29_s1 = inlined_call_operand.vmem [shape: f32[16,8], index: 1, kind: output, shape index: {}]  }
   0x1   :  { %v4_v0 = vld [vmem:[%s28_s0] ss:$0 sm:$0xff] }
   0x2   :  { %5 = vst [vmem:[%s29_s1] sm:$0xff] %v4_v0  ;;  %8 = vst [vmem:[%s29_s1 + $0x8] sm:$0xff] %v4_v0 }

// kernel: tile.7
= control target key start
LH: loop header
LB: loop body
LE: loop exit
PB: predicated region body
PF: predicated region fallthrough
CT: control target
= control target key end

     0   :  { %s131_s10 = smov 120   ;;  %s132_s11 = smov 104   ;;  %vm3_vm0 = vcmask 64512   ;;  %vm9_vm1 = vcmask 1048512   ;;  %vm15_vm2 = vcmask 982912   ;;  %vm21_vm3 = vcmask 917312   ;;  %s207_s0 = inlined_call_operand.vmem [shape: f32[16,8], index: 0, kind: input, shape index: {}]   ;;  %s208_s1 = inlined_call_operand.vmem [shape: f32[1,128], index: 1, kind: output, shape index: {}]  }
   0x1   :  { %v101_v0 = vld [vmem:[%s207_s0 + $0xf] sm:$0x1]   ;;  %v103_v1 = vld [vmem:[%s207_s0 + $0xd] sm:$0x1]   ;;  %v102_v2 = vld [vmem:[%s207_s0 + $0xe] sm:$0x1]  }
   0x2   :  { %7 = vrot.lane.b32.xlu0 %v101_v0, %s131_s10  ;;  %19 = vrot.lane.b32.xlu1 %v103_v1, %s132_s11  ;;  %v104_v3 = vld [vmem:[%s207_s0 + $0xc] sm:$0x1]   ;;  %s133_s16 = smov 112   ;;  %s134_s17 = smov 96   ;;  %v105_v4 = vld [vmem:[%s207_s0 + $0xb] sm:$0x1]  }
   0x3   :  { %v106_v5 = vld [vmem:[%s207_s0 + $0xa] sm:$0x1]   ;;  %v2_v6 = vld [vmem:[%s207_s0] sm:$0x1]   ;;  %s135_s24 = smov 88   ;;  %s136_s25 = smov 80  }
   0x4   :  { %4 = vst.msk [vmem:[#allocation0] sm:$0x1] %vm3_vm0, %v2_v6   ;;  %v107_v7 = vld [vmem:[%s207_s0 + $0x9] sm:$0x1]   ;;  %v108_v8 = vld [vmem:[%s207_s0 + $0x8] sm:$0x1]  }
   0x5   :  { %s137_s30 = smov 72   ;;  %s138_s2 = smov 64   ;;  %v109_v9 = vld [vmem:[%s207_s0 + $0x7] sm:$0x1]   ;;  %v110_v10 = vld [vmem:[%s207_s0 + $0x6] sm:$0x1]  }
   0x6   :  { %13 = vrot.lane.b32.xlu0 %v102_v2, %s133_s16  ;;  %25 = vrot.lane.b32.xlu1 %v104_v3, %s134_s17  ;;  %s139_s7 = smov 56   ;;  %s140_s8 = smov 48   ;;  %v111_v11 = vld [vmem:[%s207_s0 + $0x5] sm:$0x1]   ;;  %v112_v12 = vld [vmem:[%s207_s0 + $0x4] sm:$0x1]  }
   0x7   :  { %s141_s13 = smov 40   ;;  %s142_s14 = smov 32   ;;  %v113_v13 = vld [vmem:[%s207_s0 + $0x3] sm:$0x1]   ;;  %v114_v14 = vld [vmem:[%s207_s0 + $0x2] sm:$0x1]  }
   0x8   :  { %s143_s19 = smov 24   ;;  %s144_s20 = smov 16   ;;  %v115_v15 = vld [vmem:[%s207_s0 + $0x1] sm:$0x1]   ;;  %vm27_vm4 = vcmask 851712   ;;  %vm33_vm5 = vcmask 786112  }
   0x9   :  { %s145_s0 = smov 8   ;;  %vm39_vm6 = vcmask 720512   ;;  %vm45_vm7 = vcmask 654912   ;;  %vm51_vm8 = vcmask 589312   ;;  %vm57_vm9 = vcmask 523712  }
   0xa   :  { %31 = vrot.lane.b32.xlu0 %v105_v4, %s135_s24  ;;  %37 = vrot.lane.b32.xlu1 %v106_v5, %s136_s25  ;;  %vm63_vm10 = vcmask 458112   ;;  %vm69_vm11 = vcmask 392512   ;;  %vm75_vm12 = vcmask 326912   ;;  %vm81_vm13 = vcmask 261312  }
   0xb   :  { %vm87_vm14 = vcmask 195712   ;;  %vm93_vm15 = vcmask 130112  }
   0xe   :  { %43 = vrot.lane.b32.xlu0 %v107_v7, %s137_s30  ;;  %49 = vrot.lane.b32.xlu1 %v108_v8, %s138_s2 }
  0x12   :  { %55 = vrot.lane.b32.xlu0 %v109_v9, %s139_s7  ;;  %61 = vrot.lane.b32.xlu1 %v110_v10, %s140_s8 }
  0x16   :  { %67 = vrot.lane.b32.xlu0 %v111_v11, %s141_s13  ;;  %73 = vrot.lane.b32.xlu1 %v112_v12, %s142_s14 }
  0x1a   :  { %79 = vrot.lane.b32.xlu0 %v113_v13, %s143_s19  ;;  %85 = vrot.lane.b32.xlu1 %v114_v14, %s144_s20 }
  0x1e   :  { %91 = vrot.lane.b32.xlu0 %v115_v15, %s145_s0 }
  0x74   :  { %v8_v16 = vpop.permute.xlu0 %7   ;;  %v20_v17 = vpop.permute.xlu1 %19  }
  0x75   :  { %10 = vst.msk [vmem:[#allocation0] sm:$0x1] %vm9_vm1, %v8_v16  }
  0x78   :  { %v14_v18 = vpop.permute.xlu0 %13   ;;  %v26_v19 = vpop.permute.xlu1 %25  }
  0x79   :  { %16 = vst.msk [vmem:[#allocation0] sm:$0x1] %vm15_vm2, %v14_v18  }
  0x7a   :  { %22 = vst.msk [vmem:[#allocation0] sm:$0x1] %vm21_vm3, %v20_v17  }
  0x7b   :  { %28 = vst.msk [vmem:[#allocation0] sm:$0x1] %vm27_vm4, %v26_v19  }
  0x7c   :  { %v32_v20 = vpop.permute.xlu0 %31   ;;  %v38_v21 = vpop.permute.xlu1 %37  }
  0x7d   :  { %34 = vst.msk [vmem:[#allocation0] sm:$0x1] %vm33_vm5, %v32_v20  }
  0x7e   :  { %40 = vst.msk [vmem:[#allocation0] sm:$0x1] %vm39_vm6, %v38_v21  }
  0x80   :  { %v44_v22 = vpop.permute.xlu0 %43   ;;  %v50_v23 = vpop.permute.xlu1 %49  }
  0x81   :  { %46 = vst.msk [vmem:[#allocation0] sm:$0x1] %vm45_vm7, %v44_v22  }
  0x82   :  { %52 = vst.msk [vmem:[#allocation0] sm:$0x1] %vm51_vm8, %v50_v23  }
  0x84   :  { %v56_v24 = vpop.permute.xlu0 %55   ;;  %v62_v25 = vpop.permute.xlu1 %61  }
  0x85   :  { %58 = vst.msk [vmem:[#allocation0] sm:$0x1] %vm57_vm9, %v56_v24  }
  0x86   :  { %64 = vst.msk [vmem:[#allocation0] sm:$0x1] %vm63_vm10, %v62_v25  }
  0x88   :  { %v68_v26 = vpop.permute.xlu0 %67   ;;  %v74_v27 = vpop.permute.xlu1 %73  }
  0x89   :  { %70 = vst.msk [vmem:[#allocation0] sm:$0x1] %vm69_vm11, %v68_v26  }
  0x8a   :  { %76 = vst.msk [vmem:[#allocation0] sm:$0x1] %vm75_vm12, %v74_v27  }
  0x8c   :  { %v80_v28 = vpop.permute.xlu0 %79   ;;  %v86_v29 = vpop.permute.xlu1 %85  }
  0x8d   :  { %82 = vst.msk [vmem:[#allocation0] sm:$0x1] %vm81_vm13, %v80_v28  }
  0x8e   :  { %88 = vst.msk [vmem:[#allocation0] sm:$0x1] %vm87_vm14, %v86_v29  }
  0x90   :  { %v92_v30 = vpop.permute.xlu0 %91  }
  0x91   :  { %94 = vst.msk [vmem:[#allocation0] sm:$0x1] %vm93_vm15, %v92_v30  }
  0x98   :  { %v98_v31 = vld [vmem:[#allocation0] sm:$0x1] }
  0x99   :  { %100 = vst [vmem:[%s208_s1] sm:$0x1] %v98_v31 }

// kernel: _lambda_.1
= control target key start
LH: loop header
LB: loop body
LE: loop exit
PB: predicated region body
PF: predicated region fallthrough
CT: control target
= control target key end

     0   :  { %v240_v0 = vmov 0.0|0.0   ;;  %vm56_vm0 = vcmask 719872   ;;  %v241_v42 = vmov 0.0   ;;  %s412_s1 = inlined_call_operand.vmem [shape: f32[216,128], index: 1, kind: input, shape index: {}]   ;;  %s413_s0 = inlined_call_operand.vmem [shape: f32[2,16,216], index: 0, kind: input, shape index: {}]   ;;  %s414_s2 = inlined_call_operand.vmem [shape: f32[1,128], index: 2, kind: input, shape index: {}]   ;;  %s415_s3 = inlined_call_operand.vmem [shape: f32[2,16,128], index: 3, kind: output, shape index: {}]  }
   0x1   :  { %171 = vmatprep.subr.bf16.mxu0 %v240_v0  ;;  %210 = vmatprep.subr.bf16.mxu1 %v240_v0  ;;  %v22_v1 = vld [vmem:[%s412_s1] sm:$0xff]  ;;  %v23_v2 = vld [vmem:[%s412_s1 + $0x8] sm:$0xff]  ;;  %v24_v3 = vld [vmem:[%s412_s1 + $0x10] sm:$0xff] }
   0x2   :  { %v172_v4 = vpack.c.bf16 %v23_v2, %v22_v1  ;;  %v25_v5 = vld [vmem:[%s412_s1 + $0x18] sm:$0xff]  ;;  %v26_v7 = vld [vmem:[%s412_s1 + $0x20] sm:$0xff]  ;;  %v27_v8 = vld [vmem:[%s412_s1 + $0x28] sm:$0xff] }
   0x3   :  { %v175_v6 = vpack.c.bf16 %v25_v5, %v24_v3  ;;  %v178_v9 = vpack.c.bf16 %v27_v8, %v26_v7  ;;  %v28_v10 = vld [vmem:[%s412_s1 + $0x30] sm:$0xff]  ;;  %v29_v11 = vld [vmem:[%s412_s1 + $0x38] sm:$0xff]  ;;  %v15_v12 = vld [vmem:[%s413_s0 + $0x8] sm:$0xff] }
   0x4   :  { %173 = vmatpush1.bf16.msra.mxu0 %v172_v4  ;;  %224 = vmatpush1.bf16.msra.mxu1 %v172_v4  ;;  %v19_v13 = vld [vmem:[%s413_s0 + $0x28] sm:$0xff]  ;;  %v181_v14 = vpack.c.bf16 %v29_v11, %v28_v10  ;;  %v30_v15 = vld [vmem:[%s412_s1 + $0x40] sm:$0xff]  ;;  %v32_v18 = vld [vmem:[%s412_s1 + $0x50] sm:$0xff] }
   0x5   :  { %174 = vmatprep.subr.bf16.mxu0 %v240_v0  ;;  %211 = vmatprep.subr.bf16.mxu1 %v240_v0  ;;  %v31_v16 = vld [vmem:[%s412_s1 + $0x48] sm:$0xff]  ;;  %v33_v19 = vld [vmem:[%s412_s1 + $0x58] sm:$0xff]  ;;  %v34_v21 = vld [vmem:[%s412_s1 + $0x60] sm:$0xff] }
   0x6   :  { %167 = vmatprep.mubr.msk.f32.mxu0 %vm56_vm0, %v15_v12  ;;  %169 = vmatprep.mubr.msk.f32.mxu1 %vm56_vm0, %v19_v13  ;;  %v184_v17 = vpack.c.bf16 %v31_v16, %v30_v15  ;;  %v187_v20 = vpack.c.bf16 %v33_v19, %v32_v18  ;;  %v35_v22 = vld [vmem:[%s412_s1 + $0x68] sm:$0xff]  ;;  %v36_v24 = vld [vmem:[%s412_s1 + $0x70] sm:$0xff]  ;;  %v37_v25 = vld [vmem:[%s412_s1 + $0x78] sm:$0xff] }
   0x7   :  { %v190_v23 = vpack.c.bf16 %v35_v22, %v34_v21  ;;  %v193_v26 = vpack.c.bf16 %v37_v25, %v36_v24  ;;  %v38_v27 = vld [vmem:[%s412_s1 + $0x80] sm:$0xff]  ;;  %v39_v28 = vld [vmem:[%s412_s1 + $0x88] sm:$0xff]  ;;  %v40_v30 = vld [vmem:[%s412_s1 + $0x90] sm:$0xff] }
   0x8   :  { %176 = vmatpush1.bf16.msra.mxu0 %v175_v6  ;;  %225 = vmatpush1.bf16.msra.mxu1 %v175_v6  ;;  %v196_v29 = vpack.c.bf16 %v39_v28, %v38_v27  ;;  %v41_v31 = vld [vmem:[%s412_s1 + $0x98] sm:$0xff]  ;;  %v42_v33 = vld [vmem:[%s412_s1 + $0xa0] sm:$0xff]  ;;  %v43_v34 = vld [vmem:[%s412_s1 + $0xa8] sm:$0xff] }
   0x9   :  { %177 = vmatprep.subr.bf16.mxu0 %v240_v0  ;;  %212 = vmatprep.subr.bf16.mxu1 %v240_v0  ;;  %v199_v32 = vpack.c.bf16 %v41_v31, %v40_v30  ;;  %v202_v35 = vpack.c.bf16 %v43_v34, %v42_v33  ;;  %v44_v36 = vld [vmem:[%s412_s1 + $0xb0] sm:$0xff]  ;;  %v45_v37 = vld [vmem:[%s412_s1 + $0xb8] sm:$0xff]  ;;  %v46_v39 = vld [vmem:[%s412_s1 + $0xc0] sm:$0xff] }
   0xa   :  { %v205_v38 = vpack.c.bf16 %v45_v37, %v44_v36  ;;  %v47_v40 = vld [vmem:[%s412_s1 + $0xc8] sm:$0xff]  ;;  %v48_v43 = vld [vmem:[%s412_s1 + $0xd0] sm:$0xff]  ;;  %v14_v44 = vld [vmem:[%s413_s0] sm:$0xff] }
   0xb   :  { %v208_v41 = vpack.c.bf16 %v47_v40, %v46_v39  ;;  %v18_v45 = vld [vmem:[%s413_s0 + $0x20] sm:$0xff]  ;;  %v17_v46 = vld [vmem:[%s413_s0 + $0x18] sm:$0xff]  ;;  %v16_v48 = vld [vmem:[%s413_s0 + $0x10] sm:$0xff] }
   0xc   :  { %179 = vmatpush1.bf16.msra.mxu0 %v178_v9  ;;  %226 = vmatpush1.bf16.msra.mxu1 %v178_v9  ;;  %v21_v47 = vld [vmem:[%s413_s0 + $0x38] sm:$0xff]  ;;  %v20_v49 = vld [vmem:[%s413_s0 + $0x30] sm:$0xff]  ;;  %v166_v50 = vld [vmem:[%s414_s2] ss:$0 sm:$0xff] }
   0xd   :  { %180 = vmatprep.subr.bf16.mxu0 %v240_v0  ;;  %213 = vmatprep.subr.bf16.mxu1 %v240_v0 }
  0x10   :  { %182 = vmatpush1.bf16.msra.mxu0 %v181_v14  ;;  %227 = vmatpush1.bf16.msra.mxu1 %v181_v14 }
  0x11   :  { %183 = vmatprep.subr.bf16.mxu0 %v240_v0  ;;  %214 = vmatprep.subr.bf16.mxu1 %v240_v0 }
  0x14   :  { %185 = vmatpush1.bf16.msra.mxu0 %v184_v17  ;;  %228 = vmatpush1.bf16.msra.mxu1 %v184_v17 }
  0x15   :  { %186 = vmatprep.subr.bf16.mxu0 %v240_v0  ;;  %215 = vmatprep.subr.bf16.mxu1 %v240_v0 }
  0x18   :  { %188 = vmatpush1.bf16.msra.mxu0 %v187_v20  ;;  %229 = vmatpush1.bf16.msra.mxu1 %v187_v20 }
  0x19   :  { %189 = vmatprep.subr.bf16.mxu0 %v240_v0  ;;  %216 = vmatprep.subr.bf16.mxu1 %v240_v0 }
  0x1c   :  { %191 = vmatpush1.bf16.msra.mxu0 %v190_v23  ;;  %230 = vmatpush1.bf16.msra.mxu1 %v190_v23 }
  0x1d   :  { %192 = vmatprep.subr.bf16.mxu0 %v240_v0  ;;  %217 = vmatprep.subr.bf16.mxu1 %v240_v0 }
  0x20   :  { %194 = vmatpush1.bf16.msra.mxu0 %v193_v26  ;;  %231 = vmatpush1.bf16.msra.mxu1 %v193_v26 }
  0x21   :  { %195 = vmatprep.subr.bf16.mxu0 %v240_v0  ;;  %218 = vmatprep.subr.bf16.mxu1 %v240_v0 }
  0x24   :  { %197 = vmatpush1.bf16.msra.mxu0 %v196_v29  ;;  %232 = vmatpush1.bf16.msra.mxu1 %v196_v29 }
  0x25   :  { %198 = vmatprep.subr.bf16.mxu0 %v240_v0  ;;  %219 = vmatprep.subr.bf16.mxu1 %v240_v0 }
  0x28   :  { %200 = vmatpush1.bf16.msra.mxu0 %v199_v32  ;;  %233 = vmatpush1.bf16.msra.mxu1 %v199_v32 }
  0x29   :  { %201 = vmatprep.subr.bf16.mxu0 %v240_v0  ;;  %220 = vmatprep.subr.bf16.mxu1 %v240_v0 }
  0x2c   :  { %203 = vmatpush1.bf16.msra.mxu0 %v202_v35  ;;  %234 = vmatpush1.bf16.msra.mxu1 %v202_v35 }
  0x2d   :  { %204 = vmatprep.subr.bf16.mxu0 %v240_v0  ;;  %221 = vmatprep.subr.bf16.mxu1 %v240_v0 }
  0x30   :  { %206 = vmatpush1.bf16.msra.mxu0 %v205_v38  ;;  %235 = vmatpush1.bf16.msra.mxu1 %v205_v38 }
  0x31   :  { %207 = vmatprep.subr.bf16.mxu0 %v240_v0  ;;  %222 = vmatprep.subr.bf16.mxu1 %v240_v0 }
  0x34   :  { %209 = vmatpush1.bf16.msra.mxu0 %v208_v41  ;;  %236 = vmatpush1.bf16.msra.mxu1 %v208_v41 }
  0x35   :  { %121 = vmatprep.subr.mxu0 %v241_v42  ;;  %223 = vmatprep.subr.mxu1 %v241_v42 }
  0x38   :  { %122 = vmatpush1.msra.mxu0 %v48_v43  ;;  %237 = vmatpush1.msra.mxu1 %v48_v43 }
  0x39   :  { %134 = vmatmul.mubr.f32.vlgmr.msra.gmra.mrb[0].mxu0 %v14_v44  ;;  %144 = vmatmul.mubr.f32.vlgmr.msra.gmra.mrb[0].mxu1 %v18_v45 }
  0x3a   :  { %168 = vmatprep.mubr.msk.f32.mxu0 %vm56_vm0, %v17_v46  ;;  %170 = vmatprep.mubr.msk.f32.mxu1 %vm56_vm0, %v21_v47 }
  0x3d   :  { %139 = vmatmul.mubr.f32.gmra.mrb[2].mxu0 %v16_v48  ;;  %149 = vmatmul.mubr.f32.gmra.mrb[2].mxu1 %v20_v49 }
 0x10c   :  { %v135_v51 = vpop.f32.mrb[0].mxu0  ;;  %v145_v52 = vpop.f32.mrb[0].mxu1 }
 0x10d   :  { %v136_v53 = vadd.f32 %v166_v50, %v135_v51  ;;  %v146_v54 = vadd.f32 %v166_v50, %v145_v52  ;;  %v137_v55 = vpop.f32.mrb[1].mxu0  ;;  %v147_v56 = vpop.f32.mrb[1].mxu1 }
 0x10f   :  { %v154_v57 = vmax.f32 %v136_v53, 0.0  ;;  %v156_v58 = vmax.f32 %v146_v54, 0.0 }
 0x110   :  { %v140_v59 = vpop.f32.mrb[2].mxu0  ;;  %v150_v60 = vpop.f32.mrb[2].mxu1 }
 0x111   :  { %158 = vst [vmem:[%s415_s3] sm:$0xff] %v154_v57  ;;  %160 = vst [vmem:[%s415_s3 + $0x10] sm:$0xff] %v156_v58  ;;  %v141_v61 = vadd.f32 %v166_v50, %v140_v59  ;;  %v151_v62 = vadd.f32 %v166_v50, %v150_v60  ;;  %v142_v63 = vpop.f32.mrb[3].mxu0  ;;  %v152_v0 = vpop.f32.mrb[3].mxu1 }
 0x113   :  { %v155_v1 = vmax.f32 %v141_v61, 0.0  ;;  %v157_v2 = vmax.f32 %v151_v62, 0.0 }
 0x115   :  { %159 = vst [vmem:[%s415_s3 + $0x8] sm:$0xff] %v155_v1  ;;  %161 = vst [vmem:[%s415_s3 + $0x18] sm:$0xff] %v157_v2 }

</bundles_post_ra>
